<compile_context>
chip_gen: v5e
topology: v5e:2x2
jax: 0.10.0
libtpu: 0.0.40
codegen_flags: <defaults>
</compile_context>

<pallas_src>
import functools

import jax
import jax.numpy as jnp
from jax.experimental import pallas as pl
from jax.experimental.pallas import tpu as pltpu


def _round_up(x, m):
    return ((x + m - 1) // m) * m


def _tiled_bytes(shape, itemsize=4):
    """Real VMEM bytes of a tile: last two dims pad to (8, 128)."""
    shape = tuple(int(d) for d in shape)
    if len(shape) == 0:
        return itemsize
    if len(shape) == 1:
        return 8 * _round_up(shape[0], 128) * itemsize
    lead = 1
    for d in shape[:-2]:
        lead *= d
    return lead * _round_up(shape[-2], 8) * _round_up(shape[-1], 128) * itemsize


def _vmem_knobs():
    """(vmem_limit_bytes, per-step budget, min grid steps) per TPU generation."""
    try:
        kind = jax.devices()[0].device_kind.lower()
    except Exception:
        kind = ""
    if "v7" in kind:
        # 64 MiB physical VMEM, 2 TCs: modest working set, >=2 steps per core.
        return 48 * 1024 * 1024, 24 * 1024 * 1024, 4
    if "v5" in kind:
        # 128 MiB physical, lowest HBM BW: big tiles but keep DMA overlapped.
        return 96 * 1024 * 1024, 32 * 1024 * 1024, 8
    if "v6" in kind or "v4" in kind:
        return 96 * 1024 * 1024, 32 * 1024 * 1024, 4
    # Unknown hardware: leave the scoped limit at its default.
    return None, 16 * 1024 * 1024, 4


def _pick_batch_tile(B, per_step_bytes_fn, budget_bytes, min_steps):
    """Largest divisor of B that fits the budget and keeps enough grid steps."""
    best = 1
    need = min(min_steps, B)
    for tb in range(1, B + 1):
        if B % tb:
            continue
        if (B // tb) < need:
            continue
        if per_step_bytes_fn(tb) > budget_bytes:
            continue
        best = tb
    return best


def _flatten_conv2d_kernel(x_ref, l1_ref, l2_ref, w_ref, o_ref, pad_ref,
                           *, K, pad, Cout, GR):
    """One batch tile per grid step.  Lane-fused layout: last dim = W*C."""
    f32 = jnp.float32
    TB, H, WCin = x_ref.shape
    WC = pad_ref.shape[-1]            # W * Cout (padded spatial width, fused)
    W = WC // Cout
    Hs = H - K + 1
    Ws = W - K + 1
    WsC = Ws * Cout

    # Sublane-aligned row offsets of each parameter group in the fused slab.
    L1B, V1W, V1B, H1W, H1B, L2B, V2W, V2B, H2W, H2B = (g * GR for g in range(10))
    wp = w_ref[...]                   # tiny resident slab (10*GR, WC)

    def dconv_rows(t, w0, b0, n):
        # Depthwise valid conv along H: taps are sublane shifts.
        acc = t[:, 0:n, :] * wp[w0]
        for k in range(1, K):
            acc = acc + t[:, k:k + n, :] * wp[w0 + k]
        return acc + wp[b0]

    def dconv_lanes(t, w0, b0, n):
        # Depthwise valid conv along W: taps are lane shifts by k*Cout.
        nc = n * Cout
        acc = t[:, :, 0:nc] * wp[w0, 0:nc]
        for k in range(1, K):
            acc = acc + t[:, :, k * Cout:k * Cout + nc] * wp[w0 + k, 0:nc]
        return acc + wp[b0, 0:nc]

    # ---- stage 1: pointwise L1 as a block-diagonal MXU matmul ---------------
    x = x_ref[...].astype(f32)                                  # (TB, H, W*Cin)
    t1 = jnp.dot(x.reshape(TB * H, WCin), l1_ref[...],
                 preferred_element_type=f32) + wp[L1B]
    t1 = t1.reshape(TB, H, WC)

    # ---- stages 2-3: depthwise V1 (along H), H1 (along W) -------------------
    t2 = dconv_rows(t1, V1W, V1B, Hs)                           # (TB, Hs, WC)
    t3 = dconv_lanes(t2, H1W, H1B, Ws)                          # (TB, Hs, WsC)

    # ---- stage 4: pointwise L2 on the *unpadded* interior only --------------
    # (unconditional bias add, no iota mask, no wasted rows on the border)
    t4 = jnp.dot(t3.reshape(TB * Hs, WsC), l2_ref[...],
                 preferred_element_type=f32) + wp[L2B, 0:WsC]
    t4 = t4.reshape(TB, Hs, WsC)

    # ---- stage 5: ConstantPad2d(K//2) fused via persistent VMEM scratch -----
    # Only the border is (re)zeroed each step; the interior is overwritten.
    if pad > 0:
        zrow = jnp.zeros((TB, pad, WC), f32)
        pad_ref[:, 0:pad, :] = zrow
        pad_ref[:, pad + Hs:H, :] = zrow
        zcol = jnp.zeros((TB, H, pad * Cout), f32)
        pad_ref[:, :, 0:pad * Cout] = zcol
        pad_ref[:, :, (pad + Ws) * Cout:WC] = zcol
    pad_ref[:, pad:pad + Hs, pad * Cout:(pad + Ws) * Cout] = t4

    # ---- stages 6-7: depthwise V2 (along H), H2 (along W) -------------------
    padded = pad_ref[...]                                       # (TB, H, WC)
    t5 = dconv_rows(padded, V2W, V2B, Hs)                       # (TB, Hs, WC)
    t6 = dconv_lanes(t5, H2W, H2B, Ws)                          # (TB, Hs, WsC)

    o_ref[...] = t6.astype(o_ref.dtype)


@functools.partial(jax.jit, static_argnums=(2,))
def flatten_conv2d_forward(x_nchw, params, kernel_size):
    """params = (L1w, L1b, V1w, V1b, H1w, H1b, L2w, L2b, V2w, V2b, H2w, H2b)
    with the same shapes as the PyTorch module.  x_nchw: [B, Cin, H, W]."""
    K = int(kernel_size)
    assert K % 2 == 1, "flatten_conv2d assumes an odd kernel_size (pad = K//2)"
    pad = K // 2
    (L1w, L1b, V1w, V1b, H1w, H1b,
     L2w, L2b, V2w, V2b, H2w, H2b) = params

    B, Cin, H, W = x_nchw.shape
    Cout = L1w.shape[1]
    Hs, Ws = H - K + 1, W - K + 1
    WCin, WC, WsC = W * Cin, W * Cout, Ws * Cout
    f32 = jnp.float32

    # Lane-fused BHWC input: (B, H, W*Cin).
    x_f = jnp.transpose(x_nchw, (0, 2, 3, 1)).astype(f32).reshape(B, H, WCin)

    # Block-diagonal pointwise weights -> well-shaped MXU matmuls on the fused
    # lane layout with zero in-kernel relayout.  (Size grows O((W*C)^2) —
    # fine for moderate W.)
    l1_bd = jnp.kron(jnp.eye(W, dtype=f32), L1w.astype(f32))    # (W*Cin, W*Cout)
    l2_bd = jnp.kron(jnp.eye(Ws, dtype=f32), L2w.astype(f32))   # (Ws*Cout, Ws*Cout)

    # Fused per-lane depthwise weights / biases.  Each parameter group gets a
    # sublane-aligned block of GR rows so in-kernel slices start aligned.
    GR = _round_up(max(K, 1), 8)

    def vec(v):      # (Cout,) -> (1, W*Cout)
        return jnp.tile(v.astype(f32), W).reshape(1, WC)

    def taps(w):     # (Cout, K) -> (K, W*Cout), row k = tile(w[:, k], W)
        return jnp.tile(w.astype(f32).T, (1, W))

    groups = [vec(L1b), taps(V1w), vec(V1b), taps(H1w), vec(H1b),
              vec(L2b), taps(V2w), vec(V2b), taps(H2w), vec(H2b)]
    slab = jnp.zeros((len(groups) * GR, WC), f32)
    for g, rows in enumerate(groups):
        slab = slab.at[g * GR:g * GR + rows.shape[0]].set(rows)
    R = len(groups) * GR

    # Per-generation VMEM knobs and batch-tile choice.  Footprint uses real
    # (8,128)-padded tile bytes (lane-fused layout ~= logical bytes).
    vmem_limit, budget, min_steps = _vmem_knobs()
    w_bytes = 2 * (_tiled_bytes((WCin, WC)) + _tiled_bytes((WsC, WsC))
                   + _tiled_bytes((R, WC)))

    def per_step_bytes(tb):
        return (2 * _tiled_bytes((tb, H, WCin))        # input double buffer
                + 2 * _tiled_bytes((tb, Hs, WsC))      # output double buffer
                + _tiled_bytes((tb, H, WC))            # pad scratch
                + 8 * _tiled_bytes((tb, H, WC))        # live intermediates headroom
                + w_bytes)

    TB = _pick_batch_tile(B, per_step_bytes, budget, min_steps)
    grid = (B // TB,)

    kernel = functools.partial(_flatten_conv2d_kernel,
                               K=K, pad=pad, Cout=Cout, GR=GR)

    out_f = pl.pallas_call(
        kernel,
        out_shape=jax.ShapeDtypeStruct((B, Hs, WsC), f32),
        grid=grid,
        in_specs=[
            pl.BlockSpec((TB, H, WCin), lambda b: (b, 0, 0)),   # fused input
            pl.BlockSpec((WCin, WC), lambda b: (0, 0)),         # L1 block-diag
            pl.BlockSpec((WsC, WsC), lambda b: (0, 0)),         # L2 block-diag
            pl.BlockSpec((R, WC), lambda b: (0, 0)),            # fused slab
        ],
        out_specs=pl.BlockSpec((TB, Hs, WsC), lambda b: (b, 0, 0)),
        scratch_shapes=[pltpu.VMEM((TB, H, WC), f32)],
        compiler_params=pltpu.CompilerParams(
            dimension_semantics=("parallel",),
            vmem_limit_bytes=vmem_limit,
        ),
    )(x_f, l1_bd, l2_bd, slab)

    # fused (B, Hs, Ws*Cout) -> NCHW (B, Cout, Hs, Ws)
    return jnp.transpose(out_f.reshape(B, Hs, Ws, Cout), (0, 3, 1, 2))


def flatten_conv2d_reference(x_nchw, params, kernel_size):
    """Pure-JAX reference mirroring the PyTorch forward semantics."""
    K = int(kernel_size)
    p = K // 2
    (L1w, L1b, V1w, V1b, H1w, H1b,
     L2w, L2b, V2w, V2b, H2w, H2b) = params
    x = jnp.transpose(x_nchw, (0, 2, 3, 1)).astype(jnp.float32)  # BHWC

    def pw(t, w, b):
        return jnp.einsum('bhwc,co->bhwo', t, w) + b

    def dwc_h(t, w, b):  # w: [C, K], valid cross-correlation along H
        Hout = t.shape[1] - K + 1
        acc = sum(t[:, k:k + Hout, :, :] * w[:, k] for k in range(K))
        return acc + b

    def dwc_w(t, w, b):  # along W
        Wout = t.shape[2] - K + 1
        acc = sum(t[:, :, k:k + Wout, :] * w[:, k] for k in range(K))
        return acc + b

    t = pw(x, L1w, L1b)
    t = dwc_h(t, V1w, V1b)
    t = dwc_w(t, H1w, H1b)
    t = pw(t, L2w, L2b)
    t = jnp.pad(t, ((0, 0), (p, p), (p, p), (0, 0)))
    t = dwc_h(t, V2w, V2b)
    t = dwc_w(t, H2w, H2b)
    return jnp.transpose(t, (0, 3, 1, 2))


if __name__ == "__main__":
    B, Cin, H, W = 2, 4, 16, 16
    Cout, K = 8, 3

    key = jax.random.PRNGKey(0)
    keys = jax.random.split(key, 13)

    def u(k, shape):
        return jax.random.uniform(k, shape, jnp.float32, -0.1, 0.1)

    params = (
        u(keys[0], (Cin, Cout)),  u(keys[1], (Cout,)),   # L1
        u(keys[2], (Cout, K)),    u(keys[3], (Cout,)),   # V1
        u(keys[4], (Cout, K)),    u(keys[5], (Cout,)),   # H1
        u(keys[6], (Cout, Cout)), u(keys[7], (Cout,)),   # L2
        u(keys[8], (Cout, K)),    u(keys[9], (Cout,)),   # V2
        u(keys[10], (Cout, K)),   u(keys[11], (Cout,)),  # H2
    )
    x = jax.random.normal(keys[12], (B, Cin, H, W), jnp.float32)

    out = jax.block_until_ready(flatten_conv2d_forward(x, params, K))
    ref = jax.block_until_ready(flatten_conv2d_reference(x, params, K))

    assert out.shape == (B, Cout, H - K + 1, W - K + 1), out.shape
    assert jnp.allclose(out, ref, atol=1e-4, rtol=1e-4), float(
        jnp.max(jnp.abs(out - ref)))

    print("KERNEL_OK")
</pallas_src>

<mosaic_0001>
module attributes {stable_mosaic.version = 11 : i64} {
  func.func @_flatten_conv2d_kernel(%arg0: i32, %arg1: memref<1x16x64xf32, #tpu.memory_space<vmem>>, %arg2: memref<64x128xf32, #tpu.memory_space<vmem>>, %arg3: memref<112x112xf32, #tpu.memory_space<vmem>>, %arg4: memref<80x128xf32, #tpu.memory_space<vmem>>, %arg5: memref<1x14x112xf32, #tpu.memory_space<vmem>>, %arg6: memref<1x16x128xf32, #tpu.memory_space<vmem>>) attributes {dimension_semantics = [#tpu.dimension_semantics<parallel>], iteration_bounds = array<i64: 2>, scalar_prefetch = 0 : i64, scratch_operands = 1 : i64, tpu.core_type = #tpu.core_type<tc>, window_params = [{transform_indices = @transform_0, window_bounds = array<i64: 1, 16, 64>}, {pipeline_mode = #tpu.pipeline_mode<synchronous>, transform_indices = @transform_1, window_bounds = array<i64: 64, 128>}, {pipeline_mode = #tpu.pipeline_mode<synchronous>, transform_indices = @transform_2, window_bounds = array<i64: 112, 112>}, {pipeline_mode = #tpu.pipeline_mode<synchronous>, transform_indices = @transform_3, window_bounds = array<i64: 80, 128>}, {transform_indices = @transform_4, window_bounds = array<i64: 1, 14, 112>}]} {
    %c0 = arith.constant 0 : index
    %c0_0 = arith.constant 0 : index
    %0 = vector.load %arg4[%c0, %c0_0] : memref<80x128xf32, #tpu.memory_space<vmem>>, vector<80x128xf32>
    %c0_1 = arith.constant 0 : index
    %c0_2 = arith.constant 0 : index
    %c0_3 = arith.constant 0 : index
    %1 = vector.load %arg1[%c0_1, %c0_2, %c0_3] : memref<1x16x64xf32, #tpu.memory_space<vmem>>, vector<1x16x64xf32>
    %2 = vector.shape_cast %1 : vector<1x16x64xf32> to vector<16x64xf32>
    %c0_4 = arith.constant 0 : index
    %c0_5 = arith.constant 0 : index
    %3 = vector.load %arg2[%c0_4, %c0_5] : memref<64x128xf32, #tpu.memory_space<vmem>>, vector<64x128xf32>
    %cst = arith.constant dense<0.000000e+00> : vector<16x128xf32>
    %4 = tpu.matmul %2, %3, %cst {dimension_numbers = #tpu.dot_dimension_numbers<[1], [0], [0], [1], [0, 0, 1, 1], [], []>} : vector<16x64xf32>, vector<64x128xf32>, vector<16x128xf32> -> vector<16x128xf32>
    %5 = vector.extract_strided_slice %0 {offsets = [0, 0], sizes = [1, 128], strides = [1, 1]} : vector<80x128xf32> to vector<1x128xf32>
    %6 = vector.shape_cast %5 : vector<1x128xf32> to vector<128xf32>
    %7 = vector.shape_cast %6 : vector<128xf32> to vector<1x128xf32>
    %8 = vector.broadcast %7 : vector<1x128xf32> to vector<16x128xf32>
    %9 = arith.addf %4, %8 : vector<16x128xf32>
    %10 = vector.shape_cast %9 : vector<16x128xf32> to vector<1x16x128xf32>
    %11 = vector.extract_strided_slice %10 {offsets = [0, 0, 0], sizes = [1, 14, 128], strides = [1, 1, 1]} : vector<1x16x128xf32> to vector<1x14x128xf32>
    %12 = vector.extract_strided_slice %0 {offsets = [8, 0], sizes = [1, 128], strides = [1, 1]} : vector<80x128xf32> to vector<1x128xf32>
    %13 = vector.shape_cast %12 : vector<1x128xf32> to vector<128xf32>
    %14 = vector.shape_cast %13 : vector<128xf32> to vector<1x1x128xf32>
    %15 = vector.broadcast %14 : vector<1x1x128xf32> to vector<1x14x128xf32>
    %16 = arith.mulf %11, %15 : vector<1x14x128xf32>
    %17 = vector.extract_strided_slice %10 {offsets = [0, 1, 0], sizes = [1, 14, 128], strides = [1, 1, 1]} : vector<1x16x128xf32> to vector<1x14x128xf32>
    %18 = vector.extract_strided_slice %0 {offsets = [9, 0], sizes = [1, 128], strides = [1, 1]} : vector<80x128xf32> to vector<1x128xf32>
    %19 = vector.shape_cast %18 : vector<1x128xf32> to vector<128xf32>
    %20 = vector.shape_cast %19 : vector<128xf32> to vector<1x1x128xf32>
    %21 = vector.broadcast %20 : vector<1x1x128xf32> to vector<1x14x128xf32>
    %22 = arith.mulf %17, %21 : vector<1x14x128xf32>
    %23 = arith.addf %16, %22 : vector<1x14x128xf32>
    %24 = vector.extract_strided_slice %10 {offsets = [0, 2, 0], sizes = [1, 14, 128], strides = [1, 1, 1]} : vector<1x16x128xf32> to vector<1x14x128xf32>
    %25 = vector.extract_strided_slice %0 {offsets = [10, 0], sizes = [1, 128], strides = [1, 1]} : vector<80x128xf32> to vector<1x128xf32>
    %26 = vector.shape_cast %25 : vector<1x128xf32> to vector<128xf32>
    %27 = vector.shape_cast %26 : vector<128xf32> to vector<1x1x128xf32>
    %28 = vector.broadcast %27 : vector<1x1x128xf32> to vector<1x14x128xf32>
    %29 = arith.mulf %24, %28 : vector<1x14x128xf32>
    %30 = arith.addf %23, %29 : vector<1x14x128xf32>
    %31 = vector.extract_strided_slice %0 {offsets = [16, 0], sizes = [1, 128], strides = [1, 1]} : vector<80x128xf32> to vector<1x128xf32>
    %32 = vector.shape_cast %31 : vector<1x128xf32> to vector<128xf32>
    %33 = vector.shape_cast %32 : vector<128xf32> to vector<1x1x128xf32>
    %34 = vector.broadcast %33 : vector<1x1x128xf32> to vector<1x14x128xf32>
    %35 = arith.addf %30, %34 : vector<1x14x128xf32>
    %36 = vector.extract_strided_slice %35 {offsets = [0, 0, 0], sizes = [1, 14, 112], strides = [1, 1, 1]} : vector<1x14x128xf32> to vector<1x14x112xf32>
    %37 = vector.extract_strided_slice %0 {offsets = [24, 0], sizes = [1, 112], strides = [1, 1]} : vector<80x128xf32> to vector<1x112xf32>
    %38 = vector.shape_cast %37 : vector<1x112xf32> to vector<112xf32>
    %39 = vector.shape_cast %38 : vector<112xf32> to vector<1x1x112xf32>
    %40 = vector.broadcast %39 : vector<1x1x112xf32> to vector<1x14x112xf32>
    %41 = arith.mulf %36, %40 : vector<1x14x112xf32>
    %42 = vector.extract_strided_slice %35 {offsets = [0, 0, 8], sizes = [1, 14, 112], strides = [1, 1, 1]} : vector<1x14x128xf32> to vector<1x14x112xf32>
    %43 = vector.extract_strided_slice %0 {offsets = [25, 0], sizes = [1, 112], strides = [1, 1]} : vector<80x128xf32> to vector<1x112xf32>
    %44 = vector.shape_cast %43 : vector<1x112xf32> to vector<112xf32>
    %45 = vector.shape_cast %44 : vector<112xf32> to vector<1x1x112xf32>
    %46 = vector.broadcast %45 : vector<1x1x112xf32> to vector<1x14x112xf32>
    %47 = arith.mulf %42, %46 : vector<1x14x112xf32>
    %48 = arith.addf %41, %47 : vector<1x14x112xf32>
    %49 = vector.extract_strided_slice %35 {offsets = [0, 0, 16], sizes = [1, 14, 112], strides = [1, 1, 1]} : vector<1x14x128xf32> to vector<1x14x112xf32>
    %50 = vector.extract_strided_slice %0 {offsets = [26, 0], sizes = [1, 112], strides = [1, 1]} : vector<80x128xf32> to vector<1x112xf32>
    %51 = vector.shape_cast %50 : vector<1x112xf32> to vector<112xf32>
    %52 = vector.shape_cast %51 : vector<112xf32> to vector<1x1x112xf32>
    %53 = vector.broadcast %52 : vector<1x1x112xf32> to vector<1x14x112xf32>
    %54 = arith.mulf %49, %53 : vector<1x14x112xf32>
    %55 = arith.addf %48, %54 : vector<1x14x112xf32>
    %56 = vector.extract_strided_slice %0 {offsets = [32, 0], sizes = [1, 112], strides = [1, 1]} : vector<80x128xf32> to vector<1x112xf32>
    %57 = vector.shape_cast %56 : vector<1x112xf32> to vector<112xf32>
    %58 = vector.shape_cast %57 : vector<112xf32> to vector<1x1x112xf32>
    %59 = vector.broadcast %58 : vector<1x1x112xf32> to vector<1x14x112xf32>
    %60 = arith.addf %55, %59 : vector<1x14x112xf32>
    %61 = vector.shape_cast %60 : vector<1x14x112xf32> to vector<14x112xf32>
    %c0_6 = arith.constant 0 : index
    %c0_7 = arith.constant 0 : index
    %62 = vector.load %arg3[%c0_6, %c0_7] : memref<112x112xf32, #tpu.memory_space<vmem>>, vector<112x112xf32>
    %cst_8 = arith.constant dense<0.000000e+00> : vector<14x112xf32>
    %63 = tpu.matmul %61, %62, %cst_8 {dimension_numbers = #tpu.dot_dimension_numbers<[1], [0], [0], [1], [0, 0, 1, 1], [], []>} : vector<14x112xf32>, vector<112x112xf32>, vector<14x112xf32> -> vector<14x112xf32>
    %64 = vector.extract_strided_slice %0 {offsets = [40, 0], sizes = [1, 112], strides = [1, 1]} : vector<80x128xf32> to vector<1x112xf32>
    %65 = vector.shape_cast %64 : vector<1x112xf32> to vector<112xf32>
    %66 = vector.shape_cast %65 : vector<112xf32> to vector<1x112xf32>
    %67 = vector.broadcast %66 : vector<1x112xf32> to vector<14x112xf32>
    %68 = arith.addf %63, %67 : vector<14x112xf32>
    %69 = vector.shape_cast %68 : vector<14x112xf32> to vector<1x14x112xf32>
    %cst_9 = arith.constant 0.000000e+00 : f32
    %70 = vector.broadcast %cst_9 : f32 to vector<1x1x128xf32>
    %c0_10 = arith.constant 0 : index
    %c0_11 = arith.constant 0 : index
    %c0_12 = arith.constant 0 : index
    %71 = vector.load %arg6[%c0_10, %c0_11, %c0_12] : memref<1x16x128xf32, #tpu.memory_space<vmem>>, vector<1x1x128xf32>
    tpu.vector_store %arg6[%c0_10, %c0_11, %c0_12], %70 {strides = array<i32>} : memref<1x16x128xf32, #tpu.memory_space<vmem>>, vector<1x1x128xf32>,
    %c0_13 = arith.constant 0 : index
    %c15 = arith.constant 15 : index
    %c0_14 = arith.constant 0 : index
    %72 = vector.load %arg6[%c0_13, %c15, %c0_14] : memref<1x16x128xf32, #tpu.memory_space<vmem>>, vector<1x1x128xf32>
    tpu.vector_store %arg6[%c0_13, %c15, %c0_14], %70 {strides = array<i32>} : memref<1x16x128xf32, #tpu.memory_space<vmem>>, vector<1x1x128xf32>,
    %cst_15 = arith.constant 0.000000e+00 : f32
    %73 = vector.broadcast %cst_15 : f32 to vector<1x16x8xf32>
    %c0_16 = arith.constant 0 : index
    %c0_17 = arith.constant 0 : index
    %c0_18 = arith.constant 0 : index
    %74 = vector.load %arg6[%c0_16, %c0_17, %c0_18] : memref<1x16x128xf32, #tpu.memory_space<vmem>>, vector<1x16x8xf32>
    tpu.vector_store %arg6[%c0_16, %c0_17, %c0_18], %73 {strides = array<i32>} : memref<1x16x128xf32, #tpu.memory_space<vmem>>, vector<1x16x8xf32>,
    %c0_19 = arith.constant 0 : index
    %c0_20 = arith.constant 0 : index
    %c120 = arith.constant 120 : index
    %75 = vector.load %arg6[%c0_19, %c0_20, %c120] : memref<1x16x128xf32, #tpu.memory_space<vmem>>, vector<1x16x8xf32>
    tpu.vector_store %arg6[%c0_19, %c0_20, %c120], %73 {strides = array<i32>} : memref<1x16x128xf32, #tpu.memory_space<vmem>>, vector<1x16x8xf32>,
    %c0_21 = arith.constant 0 : index
    %c1 = arith.constant 1 : index
    %c8 = arith.constant 8 : index
    %76 = vector.load %arg6[%c0_21, %c1, %c8] : memref<1x16x128xf32, #tpu.memory_space<vmem>>, vector<1x14x112xf32>
    tpu.vector_store %arg6[%c0_21, %c1, %c8], %69 {strides = array<i32>} : memref<1x16x128xf32, #tpu.memory_space<vmem>>, vector<1x14x112xf32>,
    %c0_22 = arith.constant 0 : index
    %c0_23 = arith.constant 0 : index
    %c0_24 = arith.constant 0 : index
    %77 = vector.load %arg6[%c0_22, %c0_23, %c0_24] : memref<1x16x128xf32, #tpu.memory_space<vmem>>, vector<1x16x128xf32>
    %78 = vector.extract_strided_slice %77 {offsets = [0, 0, 0], sizes = [1, 14, 128], strides = [1, 1, 1]} : vector<1x16x128xf32> to vector<1x14x128xf32>
    %79 = vector.extract_strided_slice %0 {offsets = [48, 0], sizes = [1, 128], strides = [1, 1]} : vector<80x128xf32> to vector<1x128xf32>
    %80 = vector.shape_cast %79 : vector<1x128xf32> to vector<128xf32>
    %81 = vector.shape_cast %80 : vector<128xf32> to vector<1x1x128xf32>
    %82 = vector.broadcast %81 : vector<1x1x128xf32> to vector<1x14x128xf32>
    %83 = arith.mulf %78, %82 : vector<1x14x128xf32>
    %84 = vector.extract_strided_slice %77 {offsets = [0, 1, 0], sizes = [1, 14, 128], strides = [1, 1, 1]} : vector<1x16x128xf32> to vector<1x14x128xf32>
    %85 = vector.extract_strided_slice %0 {offsets = [49, 0], sizes = [1, 128], strides = [1, 1]} : vector<80x128xf32> to vector<1x128xf32>
    %86 = vector.shape_cast %85 : vector<1x128xf32> to vector<128xf32>
    %87 = vector.shape_cast %86 : vector<128xf32> to vector<1x1x128xf32>
    %88 = vector.broadcast %87 : vector<1x1x128xf32> to vector<1x14x128xf32>
    %89 = arith.mulf %84, %88 : vector<1x14x128xf32>
    %90 = arith.addf %83, %89 : vector<1x14x128xf32>
    %91 = vector.extract_strided_slice %77 {offsets = [0, 2, 0], sizes = [1, 14, 128], strides = [1, 1, 1]} : vector<1x16x128xf32> to vector<1x14x128xf32>
    %92 = vector.extract_strided_slice %0 {offsets = [50, 0], sizes = [1, 128], strides = [1, 1]} : vector<80x128xf32> to vector<1x128xf32>
    %93 = vector.shape_cast %92 : vector<1x128xf32> to vector<128xf32>
    %94 = vector.shape_cast %93 : vector<128xf32> to vector<1x1x128xf32>
    %95 = vector.broadcast %94 : vector<1x1x128xf32> to vector<1x14x128xf32>
    %96 = arith.mulf %91, %95 : vector<1x14x128xf32>
    %97 = arith.addf %90, %96 : vector<1x14x128xf32>
    %98 = vector.extract_strided_slice %0 {offsets = [56, 0], sizes = [1, 128], strides = [1, 1]} : vector<80x128xf32> to vector<1x128xf32>
    %99 = vector.shape_cast %98 : vector<1x128xf32> to vector<128xf32>
    %100 = vector.shape_cast %99 : vector<128xf32> to vector<1x1x128xf32>
    %101 = vector.broadcast %100 : vector<1x1x128xf32> to vector<1x14x128xf32>
    %102 = arith.addf %97, %101 : vector<1x14x128xf32>
    %103 = vector.extract_strided_slice %102 {offsets = [0, 0, 0], sizes = [1, 14, 112], strides = [1, 1, 1]} : vector<1x14x128xf32> to vector<1x14x112xf32>
    %104 = vector.extract_strided_slice %0 {offsets = [64, 0], sizes = [1, 112], strides = [1, 1]} : vector<80x128xf32> to vector<1x112xf32>
    %105 = vector.shape_cast %104 : vector<1x112xf32> to vector<112xf32>
    %106 = vector.shape_cast %105 : vector<112xf32> to vector<1x1x112xf32>
    %107 = vector.broadcast %106 : vector<1x1x112xf32> to vector<1x14x112xf32>
    %108 = arith.mulf %103, %107 : vector<1x14x112xf32>
    %109 = vector.extract_strided_slice %102 {offsets = [0, 0, 8], sizes = [1, 14, 112], strides = [1, 1, 1]} : vector<1x14x128xf32> to vector<1x14x112xf32>
    %110 = vector.extract_strided_slice %0 {offsets = [65, 0], sizes = [1, 112], strides = [1, 1]} : vector<80x128xf32> to vector<1x112xf32>
    %111 = vector.shape_cast %110 : vector<1x112xf32> to vector<112xf32>
    %112 = vector.shape_cast %111 : vector<112xf32> to vector<1x1x112xf32>
    %113 = vector.broadcast %112 : vector<1x1x112xf32> to vector<1x14x112xf32>
    %114 = arith.mulf %109, %113 : vector<1x14x112xf32>
    %115 = arith.addf %108, %114 : vector<1x14x112xf32>
    %116 = vector.extract_strided_slice %102 {offsets = [0, 0, 16], sizes = [1, 14, 112], strides = [1, 1, 1]} : vector<1x14x128xf32> to vector<1x14x112xf32>
    %117 = vector.extract_strided_slice %0 {offsets = [66, 0], sizes = [1, 112], strides = [1, 1]} : vector<80x128xf32> to vector<1x112xf32>
    %118 = vector.shape_cast %117 : vector<1x112xf32> to vector<112xf32>
    %119 = vector.shape_cast %118 : vector<112xf32> to vector<1x1x112xf32>
    %120 = vector.broadcast %119 : vector<1x1x112xf32> to vector<1x14x112xf32>
    %121 = arith.mulf %116, %120 : vector<1x14x112xf32>
    %122 = arith.addf %115, %121 : vector<1x14x112xf32>
    %123 = vector.extract_strided_slice %0 {offsets = [72, 0], sizes = [1, 112], strides = [1, 1]} : vector<80x128xf32> to vector<1x112xf32>
    %124 = vector.shape_cast %123 : vector<1x112xf32> to vector<112xf32>
    %125 = vector.shape_cast %124 : vector<112xf32> to vector<1x1x112xf32>
    %126 = vector.broadcast %125 : vector<1x1x112xf32> to vector<1x14x112xf32>
    %127 = arith.addf %122, %126 : vector<1x14x112xf32>
    %c0_25 = arith.constant 0 : index
    %c0_26 = arith.constant 0 : index
    %c0_27 = arith.constant 0 : index
    %128 = vector.load %arg5[%c0_25, %c0_26, %c0_27] : memref<1x14x112xf32, #tpu.memory_space<vmem>>, vector<1x14x112xf32>
    tpu.vector_store %arg5[%c0_25, %c0_26, %c0_27], %127 {strides = array<i32>} : memref<1x14x112xf32, #tpu.memory_space<vmem>>, vector<1x14x112xf32>,
    return
  }
  func.func @transform_0(%arg0: i32) -> (i32, i32, i32) {
    %c0_i32 = arith.constant 0 : i32
    %c0_i32_0 = arith.constant 0 : i32
    %c0_i32_1 = arith.constant 0 : i32
    return %arg0, %c0_i32, %c0_i32_0 : i32, i32, i32
  }
  func.func @transform_1(%arg0: i32) -> (i32, i32) {
    %c0_i32 = arith.constant 0 : i32
    %c0_i32_0 = arith.constant 0 : i32
    %c0_i32_1 = arith.constant 0 : i32
    return %c0_i32, %c0_i32_0 : i32, i32
  }
  func.func @transform_2(%arg0: i32) -> (i32, i32) {
    %c0_i32 = arith.constant 0 : i32
    %c0_i32_0 = arith.constant 0 : i32
    %c0_i32_1 = arith.constant 0 : i32
    return %c0_i32, %c0_i32_0 : i32, i32
  }
  func.func @transform_3(%arg0: i32) -> (i32, i32) {
    %c0_i32 = arith.constant 0 : i32
    %c0_i32_0 = arith.constant 0 : i32
    %c0_i32_1 = arith.constant 0 : i32
    return %c0_i32, %c0_i32_0 : i32, i32
  }
  func.func @transform_4(%arg0: i32) -> (i32, i32, i32) {
    %c0_i32 = arith.constant 0 : i32
    %c0_i32_0 = arith.constant 0 : i32
    %c0_i32_1 = arith.constant 0 : i32
    return %arg0, %c0_i32, %c0_i32_0 : i32, i32, i32
  }
}

</mosaic_0001>

<bundles_post_ra>
// kernel: tile.53
= control target key start
LH: loop header
LB: loop body
LE: loop exit
PB: predicated region body
PF: predicated region fallthrough
CT: control target
= control target key end

     0   :  { %s28_s0 = inlined_call_operand.vmem [shape: f32[8], index: 0, kind: input, shape index: {}]   ;;  %s29_s1 = inlined_call_operand.vmem [shape: f32[16,8], index: 1, kind: output, shape index: {}]  }
   0x1   :  { %v4_v0 = vld [vmem:[%s28_s0] ss:$0 sm:$0xff] }
   0x2   :  { %5 = vst [vmem:[%s29_s1] sm:$0xff] %v4_v0 }
   0x3   :  { %8 = vst [vmem:[%s29_s1 + $0x8] sm:$0xff] %v4_v0 }

// kernel: flatten_conv2d_forward.1
= control target key start
LH: loop header
LB: loop body
LE: loop exit
PB: predicated region body
PF: predicated region fallthrough
CT: control target
= control target key end

     0   :  { %s598_s15 = smov 0   ;;  %s749_s0 = inlined_call_operand.vmem [shape: f32[2,16,64], index: 0, kind: input, shape index: {}]   ;;  %s750_s1 = inlined_call_operand.vmem [shape: f32[64,128], index: 1, kind: input, shape index: {}]   ;;  %s751_s2 = inlined_call_operand.vmem [shape: f32[112,112], index: 2, kind: input, shape index: {}]   ;;  %s752_s3 = inlined_call_operand.vmem [shape: f32[80,128], index: 3, kind: input, shape index: {}]   ;;  %s753_s4 = inlined_call_operand.vmem [shape: f32[2,14,112], index: 4, kind: output, shape index: {}]  }
   0x1 LB: > { %s516_s16 = sadd.s32 4294967295, %s566_s15   ;;  %p520_p0 = scmp.ge.s32.totalorder %s566_s15, 1  ;;  %s566_s15 = sphi %s598_s15, %s14_s15  }
   0x2   : > { %p162_p1 = scmp.lt.s32.totalorder %s566_s15, 3 }
   0x4   : > { %p163_p2 = pnand %p520_p0, %p162_p1 }
   0x5   : > { %p188_p3 = scmp.lt.s32.totalorder (!%p163_p2), %s516_s16, 1  ;;  %s568_s27 = smov (!%p163_p2), 8  }
   0x6   : > { %166 = sbr.rel (%p163_p2) target bundleno = 700 (0x2bc), region = 36  ;;  %s569_s14 = smov (!%p163_p2), 16  }
   0x7   : > { %s570_s18 = smov (!%p163_p2), 120   ;;  %s571_s19 = smov (!%p163_p2), 112  }
   0xb   : > { %v217_v0 = vld [vmem:[%s750_s1 + $0x38] sm:$0xff]  ;;  %v216_v1 = vld [vmem:[%s750_s1 + $0x30] sm:$0xff]  ;;  %v215_v2 = vld [vmem:[%s750_s1 + $0x28] sm:$0xff]  ;;  %s755_s16 = smov (!%p188_p3, %s516_s16), 1  ;;  %vm219_vm0 = vcmask 523264   ;;  %vm257_vm1 = vcmask 1046528  }
   0xc   : > { %234 = vmatpush.msra.mxu0 %v217_v0  ;;  %v618_v3 = vld [vmem:[%s752_s3 + $0x18] sm:$0xff]  ;;  %v214_v5 = vld [vmem:[%s750_s1 + $0x20] sm:$0xff]  ;;  %s531_s30 = sshll.u32 %s755_s16, 4  ;;  %v212_v7 = vld [vmem:[%s750_s1 + $0x10] sm:$0xff]  ;;  %vm270_vm2 = vcmask 1045504   ;;  %vm336_vm3 = vcmask 916480  }
   0xd   : > { %v284_v4 = vperm.slane %v618_v3, 1  ;;  %v213_v6 = vld [vmem:[%s750_s1 + $0x18] sm:$0xff]  ;;  %v301_v8 = vperm.slane %v618_v3, 2  ;;  %v211_v9 = vld [vmem:[%s750_s1 + $0x8] sm:$0xff]  ;;  %s192_s11 = scalar_lea.vmem %s749_s0, %s531_s30  ;;  %v210_v10 = vld [vmem:[%s750_s1] sm:$0xff]  ;;  %v281_v0 = vperm.slane %v618_v3, 0  ;;  %s197_s24 = scalar_lea.vmem %s753_s4, %s531_s30 }
   0xe   : > { %235 = vmatpush.msra.mxu0 %v216_v1  ;;  %v208_v11 = vld [vmem:[%s192_s11] sm:$0xff]  ;;  %v209_v12 = vld [vmem:[%s192_s11 + $0x8] sm:$0xff]  ;;  %v332_v19 = vld [vmem:[%s751_s2 + $0x58] sm:$0xff]  ;;  %vm368_vm4 = vcmask 64512   ;;  %vm371_vm5 = vcmask 1048512   ;;  %vm382_vm6 = vcmask 982080  }
   0xf   : > { %286 = vrot.lane.b32.xlu0 %v284_v4, %s568_s27  ;;  %v198_v13 = vld [vmem:[%s752_s3] sm:$0xff]  ;;  %v334_v15 = vld [vmem:[%s751_s2 + $0x68] sm:$0xff]  ;;  %v331_v20 = vld [vmem:[%s751_s2 + $0x50] sm:$0xff]  ;;  %vm384_vm7 = vcmask 980032   ;;  %vm459_vm8 = vcmask 914432  }
  0x10   : > { %236 = vmatpush.msra.mxu0 %v215_v2  ;;  %v333_v16 = vld [vmem:[%s751_s2 + $0x60] sm:$0xff]  ;;  %v218_v17 = vperm.slane %v198_v13, 0  ;;  %345 = vmatpush.msra.mxu1 %v334_v15  ;;  %v199_v18 = vld [vmem:[%s752_s3 + $0x8] sm:$0xff]  ;;  %v328_v30 = vld [vmem:[%s751_s2 + $0x38] sm:$0xff] }
  0x11   : > { %533 = vmatpush.msra.mxu2 %v334_v15  ;;  %v252_v22 = vperm.slane %v199_v18, 1  ;;  %v330_v23 = vld [vmem:[%s751_s2 + $0x48] sm:$0xff]  ;;  %v265_v24 = vperm.slane %v199_v18, 2  ;;  %v329_v26 = vld [vmem:[%s751_s2 + $0x40] sm:$0xff]  ;;  %v249_v29 = vperm.slane %v199_v18, 0  ;;  %v200_v34 = vld [vmem:[%s752_s3 + $0x10] sm:$0xff] }
  0x12   : > { %237 = vmatpush.msra.mxu0 %v214_v5  ;;  %346 = vmatpush.msra.mxu1 %v333_v16  ;;  %v327_v35 = vld [vmem:[%s751_s2 + $0x30] sm:$0xff]  ;;  %v278_v44 = vperm.slane %v200_v34, 0  ;;  %v326_v57 = vld [vmem:[%s751_s2 + $0x28] sm:$0xff]  ;;  %v325_v58 = vld [vmem:[%s751_s2 + $0x20] sm:$0xff] }
  0x13   : > { %534 = vmatpush.msra.mxu2 %v333_v16  ;;  %v324_v59 = vld [vmem:[%s751_s2 + $0x18] sm:$0xff]  ;;  %v323_v60 = vld [vmem:[%s751_s2 + $0x10] sm:$0xff]  ;;  %v322_v61 = vld [vmem:[%s751_s2 + $0x8] sm:$0xff] }
  0x14   : > { %238 = vmatpush.msra.mxu0 %v213_v6  ;;  %347 = vmatpush.msra.mxu1 %v332_v19  ;;  %v321_v62 = vld [vmem:[%s751_s2] sm:$0xff]  ;;  %v203_v3 = vld [vmem:[%s752_s3 + $0x28] sm:$0xff] }
  0x15   : > { %535 = vmatpush.msra.mxu2 %v332_v19  ;;  %v202_v1 = vld [vmem:[%s752_s3 + $0x20] sm:$0xff]  ;;  %v335_v15 = vperm.slane %v203_v3, 0 }
  0x16   : > { %239 = vmatpush.msra.mxu0 %v212_v7  ;;  %348 = vmatpush.msra.mxu1 %v331_v20  ;;  %v318_v5 = vperm.slane %v202_v1, 0 }
  0x17   : > { %303 = vrot.lane.b32.xlu0 %v301_v8, %s569_s14  ;;  %536 = vmatpush.msra.mxu2 %v331_v20  ;;  %v572_v20 = vmov 0.0  }
  0x18   : > { %240 = vmatpush.msra.mxu0 %v211_v9  ;;  %349 = vmatpush.msra.mxu1 %v330_v23  ;;  %366 = vst [vmem:[#allocation2] sm:$0x1] %v572_v20 }
  0x19   : > { %537 = vmatpush.msra.mxu2 %v330_v23  ;;  %367 = vst [vmem:[#allocation2 + $0xf] sm:$0x1] %v572_v20 }
  0x1a   : > { %241 = vmatpush.msra.mxu0 %v210_v10  ;;  %350 = vmatpush.msra.mxu1 %v329_v26  ;;  %369 = vst.msk [vmem:[#allocation2] sm:$0xff] %vm368_vm4, %v572_v20 }
  0x1b   : > { %525 = vmatmul.msk.f32.vlgmr.msra.gmra.mxu0 %vm219_vm0, %v208_v11  ;;  %538 = vmatpush.msra.mxu2 %v329_v26  ;;  %370 = vst.msk [vmem:[#allocation2 + $0x8] sm:$0xff] %vm368_vm4, %v572_v20  ;;  %v204_v26 = vld [vmem:[%s752_s3 + $0x30] sm:$0xff] }
  0x1c   : > { %351 = vmatpush.msra.mxu1 %v328_v30  ;;  %372 = vst.msk [vmem:[#allocation2] sm:$0xff] %vm371_vm5, %v572_v20 }
  0x1d   : > { %539 = vmatpush.msra.mxu2 %v328_v30  ;;  %373 = vst.msk [vmem:[#allocation2 + $0x8] sm:$0xff] %vm371_vm5, %v572_v20 }
  0x1e   : > { %352 = vmatpush.msra.mxu1 %v327_v35 }
  0x1f   : > { %540 = vmatpush.msra.mxu2 %v327_v35 }
  0x20   : > { %353 = vmatpush.msra.mxu1 %v326_v57 }
  0x21   : > { %541 = vmatpush.msra.mxu2 %v326_v57 }
  0x22   : > { %354 = vmatpush.msra.mxu1 %v325_v58 }
  0x23   : > { %526 = vmatmul.msk.f32.gmra.mxu0 %vm219_vm0, %v209_v12  ;;  %542 = vmatpush.msra.mxu2 %v325_v58 }
  0x24   : > { %355 = vmatpush.msra.mxu1 %v324_v59 }
  0x25   : > { %543 = vmatpush.msra.mxu2 %v324_v59  ;;  %v207_v59 = vld [vmem:[%s752_s3 + $0x48] sm:$0xff] }
  0x26   : > { %356 = vmatpush.msra.mxu1 %v323_v60 }
  0x27   : > { %544 = vmatpush.msra.mxu2 %v323_v60 }
  0x28   : > { %357 = vmatpush.msra.mxu1 %v322_v61 }
  0x29   : > { %545 = vmatpush.msra.mxu2 %v322_v61 }
  0x2a   : > { %358 = vmatpush.msra.mxu1 %v321_v62 }
  0x2b   : > { %546 = vmatpush.msra.mxu2 %v321_v62 }
  0x81   : > { %v287_v45 = vpop.permute.xlu0 %286 }
  0x89   : > { %v304_v54 = vpop.permute.xlu0 %303 }
  0x98   : > { %v243_v14 = vpop.f32.mrf.mxu0 }
  0x99   : > { %v244_v21 = vadd.f32 %v243_v14, %v218_v17 }
  0x9b   : > { %v253_v27 = vmul.f32 %v252_v22, %v244_v21  ;;  %v266_v31 = vmul.f32 %v265_v24, %v244_v21  ;;  %v250_v40 = vmul.f32 %v249_v29, %v244_v21 }
  0x9d   : > { %v258_v36 = vrot.slane %v253_v27, 1  ;;  %v271_v41 = vrot.slane %v266_v31, 2  ;;  %v391_v27 = vperm.slane %v204_v26, 1  ;;  %v388_v31 = vperm.slane %v204_v26, 0 }
  0xa0   : > { %v246_v25 = vpop.f32.mrf.mxu0 }
  0xa1   : > { %v247_v28 = vadd.f32 %v246_v25, %v218_v17  ;;  %v716_v17 = vld [vmem:[%s752_s3 + $0x40] sm:$0xff] }
  0xa2   : > { %v421_v19 = vperm.slane %v716_v17, 1  ;;  %v438_v21 = vperm.slane %v716_v17, 2  ;;  %v418_v58 = vperm.slane %v716_v17, 0 }
  0xa3   : > { %v254_v32 = vmul.f32 %v252_v22, %v247_v28  ;;  %v267_v33 = vmul.f32 %v265_v24, %v247_v28  ;;  %v251_v37 = vmul.f32 %v249_v29, %v247_v28  ;;  %v403_v29 = vperm.slane %v204_v26, 2 }
  0xa5   : > { %v259_v38 = vrot.slane %v254_v32, 1  ;;  %v272_v39 = vrot.slane %v267_v33, 2 }
  0xa7   : > { %v260_v42 = vsel %vm257_vm1, %v258_v36, %v259_v38  ;;  %v264_v43 = vadd.f32 %v259_v38, %v251_v37  ;;  %v273_v48 = vsel %vm270_vm2, %v271_v41, %v272_v39  ;;  %v205_v36 = vld [vmem:[%s752_s3 + $0x38] sm:$0xff] }
  0xa8   : > { %v263_v46 = vadd.f32 %v260_v42, %v250_v40  ;;  %v415_v42 = vperm.slane %v205_v36, 0 }
  0xa9   : > { %v277_v47 = vadd.f32 %v272_v39, %v264_v43 }
  0xaa   : > { %v276_v49 = vadd.f32 %v273_v48, %v263_v46 }
  0xab   : > { %v280_v50 = vadd.f32 %v278_v44, %v277_v47 }
  0xac   : > { %v279_v51 = vadd.f32 %v278_v44, %v276_v49 }
  0xad   : > { %v290_v52 = vmul.f32 %v287_v45, %v280_v50  ;;  %v307_v55 = vmul.f32 %v304_v54, %v280_v50  ;;  %v283_v10 = vmul.f32 %v281_v0, %v280_v50 }
  0xae   : > { %v289_v53 = vmul.f32 %v287_v45, %v279_v51  ;;  %v306_v56 = vmul.f32 %v304_v54, %v279_v51  ;;  %v282_v2 = vmul.f32 %v281_v0, %v279_v51 }
  0xaf   : > { %295 = vrot.lane.b32.xlu1 %v290_v52, %s570_s18 }
  0xb0   : > { %293 = vrot.lane.b32.xlu2 %v289_v53, %s570_s18 }
  0xb7   : > { %312 = vrot.lane.b32.xlu1 %v307_v55, %s571_s19 }
  0xb8   : > { %310 = vrot.lane.b32.xlu2 %v306_v56, %s571_s19 }
  0xc0   : > { %423 = vrot.lane.b32.xlu2 %v421_v19, %s568_s27 }
 0x10a   : > { %v294_v63 = vpop.permute.xlu2 %293 }
 0x10b   : > { %v299_v4 = vadd.f32 %v294_v63, %v282_v2  ;;  %v455_v63 = vperm.slane %v207_v59, 0 }
 0x112   : > { %v311_v6 = vpop.permute.xlu2 %310 }
 0x113   : > { %v316_v7 = vadd.f32 %v311_v6, %v299_v4 }
 0x115   : > { %v319_v8 = vadd.f32 %v318_v5, %v316_v7 }
 0x117   : > { %527 = vmatmul.msk.f32.vlgmr.msra.gmra.mxu1 %vm336_vm3, %v319_v8 }
 0x11a   : > { %v424_v49 = vpop.permute.xlu2 %423 }
 0x121   : > { %v296_v9 = vpop.permute.xlu1 %295 }
 0x122   : > { %v300_v11 = vadd.f32 %v296_v9, %v283_v10 }
 0x129   : > { %v313_v12 = vpop.permute.xlu1 %312 }
 0x12a   : > { %v317_v13 = vadd.f32 %v313_v12, %v300_v11 }
 0x12c   : > { %v320_v14 = vadd.f32 %v318_v5, %v317_v13 }
 0x12e   : > { %528 = vmatmul.msk.f32.vlgmr.msra.gmra.mxu2 %vm336_vm3, %v320_v14 }
 0x194   : > { %v360_v16 = vpop.f32.mrf.mxu1 }
 0x195   : > { %v361_v18 = vadd.f32 %v360_v16, %v335_v15 }
 0x197   : > { %376 = vrot.lane.b32.xlu0 %v361_v18, %s568_s27 }
 0x19f   : > { %440 = vrot.lane.b32.xlu0 %v438_v21, %s569_s14 }
 0x1b1   : > { %v363_v22 = vpop.f32.mrf.mxu2 }
 0x1b2   : > { %v364_v23 = vadd.f32 %v363_v22, %v335_v15 }
 0x1b4   : > { %378 = vrot.lane.b32.xlu1 %v364_v23, %s568_s27 }
 0x209   : > { %v377_v24 = vpop.permute.xlu0 %376 }
 0x20a   : > { %383 = vst.msk [vmem:[#allocation2 + $0x1] sm:$0xff] %vm382_vm6, %v377_v24 }
 0x211   : > { %v386_v28 = vld [vmem:[#allocation2] sm:$0xff]  ;;  %v441_v52 = vpop.permute.xlu0 %440 }
 0x212   : > { %v392_v30 = vmul.f32 %v391_v27, %v386_v28  ;;  %v404_v34 = vmul.f32 %v403_v29, %v386_v28  ;;  %v389_v41 = vmul.f32 %v388_v31, %v386_v28 }
 0x214   : > { %v396_v38 = vrot.slane %v392_v30, 1  ;;  %v408_v45 = vrot.slane %v404_v34, 2 }
 0x226   : > { %v379_v25 = vpop.permute.xlu1 %378 }
 0x227   : > { %385 = vst.msk [vmem:[#allocation2 + $0x9] sm:$0x3f] %vm384_vm7, %v379_v25 }
 0x22e   : > { %v387_v32 = vld [vmem:[#allocation2 + $0x8] sm:$0xff] }
 0x22f   : > { %v393_v33 = vmul.f32 %v391_v27, %v387_v32  ;;  %v405_v35 = vmul.f32 %v403_v29, %v387_v32  ;;  %v390_v37 = vmul.f32 %v388_v31, %v387_v32 }
 0x231   : > { %v397_v39 = vrot.slane %v393_v33, 1  ;;  %v409_v40 = vrot.slane %v405_v35, 2 }
 0x233   : > { %v398_v43 = vsel %vm257_vm1, %v396_v38, %v397_v39  ;;  %v402_v44 = vadd.f32 %v397_v39, %v390_v37  ;;  %v410_v47 = vsel %vm270_vm2, %v408_v45, %v409_v40 }
 0x234   : > { %v401_v46 = vadd.f32 %v398_v43, %v389_v41 }
 0x235   : > { %v414_v48 = vadd.f32 %v409_v40, %v402_v44 }
 0x236   : > { %v413_v50 = vadd.f32 %v410_v47, %v401_v46 }
 0x237   : > { %v417_v51 = vadd.f32 %v415_v42, %v414_v48 }
 0x238   : > { %v416_v53 = vadd.f32 %v415_v42, %v413_v50 }
 0x239   : > { %v427_v54 = vmul.f32 %v424_v49, %v417_v51  ;;  %v444_v57 = vmul.f32 %v441_v52, %v417_v51  ;;  %v420_v4 = vmul.f32 %v418_v58, %v417_v51 }
 0x23a   : > { %v426_v55 = vmul.f32 %v424_v49, %v416_v53  ;;  %v443_v56 = vmul.f32 %v441_v52, %v416_v53  ;;  %v419_v60 = vmul.f32 %v418_v58, %v416_v53 }
 0x23b   : > { %432 = vrot.lane.b32.xlu2 %v427_v54, %s570_s18 }
 0x23c   : > { %430 = vrot.lane.b32.xlu1 %v426_v55, %s570_s18  ;;  %447 = vrot.lane.b32.xlu0 %v443_v56, %s571_s19 }
 0x244   : > { %449 = vrot.lane.b32.xlu1 %v444_v57, %s571_s19 }
 0x295   : > { %v433_v2 = vpop.permute.xlu2 %432 }
 0x296   : > { %v437_v6 = vadd.f32 %v433_v2, %v420_v4 }
 0x2ae   : > { %v431_v61 = vpop.permute.xlu1 %430  ;;  %v448_v0 = vpop.permute.xlu0 %447 }
 0x2af   : > { %v436_v62 = vadd.f32 %v431_v61, %v419_v60 }
 0x2b1   : > { %v453_v1 = vadd.f32 %v448_v0, %v436_v62 }
 0x2b3   : > { %v456_v5 = vadd.f32 %v455_v63, %v453_v1 }
 0x2b5   : > { %458 = vst.msk [vmem:[%s197_s24] sm:$0xff] %vm336_vm3, %v456_v5 }
 0x2b6   : > { %v450_v7 = vpop.permute.xlu1 %449 }
 0x2b7   : > { %v454_v8 = vadd.f32 %v450_v7, %v437_v6 }
 0x2b9   : > { %v457_v9 = vadd.f32 %v455_v63, %v454_v8 }
 0x2bb   : > { %460 = vst.msk [vmem:[%s197_s24 + $0x8] sm:$0x3f] %vm459_vm8, %v457_v9 }
 0x2bc PF: > { %s14_s15 = sadd.s32 1, %s566_s15  }
 0x2bd   : > { %p11_p4 = scmp.ge.s32.totalorder %s14_s15, 4  }
 0x2bf   :  { %13 = sbr.rel (!%p11_p4) target bundleno = 1 (0x1), region = 66 }

</bundles_post_ra>
